<compile_context>
chip_gen: v7x
topology: tpu7x:2x2x1
jax: 0.10.0
libtpu: 0.0.40
codegen_flags: <defaults>
</compile_context>

<pallas_src>
import jax
import jax.numpy as jnp
from jax.experimental import pallas as pl
from jax.experimental.pallas import tpu as pltpu

_LANE = 128


def _noise_dma_kernel(noise_hbm, out_hbm, sem):
    # One bulk HBM->HBM DMA of the entire parameter into the output buffer.
    cp = pltpu.make_async_copy(noise_hbm, out_hbm, sem)
    cp.start()
    cp.wait()


def noise_forward(noise_param: jax.Array) -> jax.Array:
    """Forward pass of `Noise`: returns the (learned) parameter tensor.

    NOTE: the ideal implementation is simply `return noise_param` -- the
    forward is an identity on the parameter.  The Pallas kernel here copies
    it with a single whole-array HBM->HBM DMA so the value still flows
    through a Pallas kernel without any VMEM round trip or grid overhead.
    """
    orig_shape = noise_param.shape
    numel = noise_param.size

    if numel == 0:
        return noise_param

    # Lane-dense 2D view when the element count allows it; otherwise a flat
    # row.  The bulk DMA is shape-agnostic either way (linear HBM copy).
    if numel % _LANE == 0:
        flat = noise_param.reshape(numel // _LANE, _LANE)
    else:
        flat = noise_param.reshape(1, numel)

    out = pl.pallas_call(
        _noise_dma_kernel,
        out_shape=jax.ShapeDtypeStruct(flat.shape, flat.dtype),
        in_specs=[pl.BlockSpec(memory_space=pl.ANY)],
        out_specs=pl.BlockSpec(memory_space=pl.ANY),
        scratch_shapes=[pltpu.SemaphoreType.DMA(())],
    )(flat)

    return out.reshape(orig_shape)


if __name__ == "__main__":
    # Deterministic parameter init, mirroring torch.randn(*dim) in __init__.
    dim = (2, 4, 16, 16)
    key = jax.random.PRNGKey(0)
    noise_param = jax.random.normal(key, dim, dtype=jnp.float32)

    result = noise_forward(noise_param)
    result = jax.block_until_ready(result)

    # Forward must return exactly the parameter tensor (bitwise).
    assert result.shape == dim
    assert result.dtype == jnp.float32
    assert bool(jnp.array_equal(result, noise_param))

    print("KERNEL_OK")
</pallas_src>

<mosaic_0001>
module attributes {stable_mosaic.version = 11 : i64} {
  func.func @_noise_dma_kernel(%arg0: memref<16x128xf32, #tpu.memory_space<any>>, %arg1: memref<16x128xf32, #tpu.memory_space<any>>, %arg2: memref<!tpu.dma_semaphore, #tpu.memory_space<semaphore_mem>>) attributes {dimension_semantics = [], scalar_prefetch = 0 : i64, scratch_operands = 1 : i64, tpu.core_type = #tpu.core_type<tc>} {
    tpu.enqueue_dma source(%arg0 : memref<16x128xf32, #tpu.memory_space<any>>) target(%arg1 : memref<16x128xf32, #tpu.memory_space<any>>) target_semaphore(%arg2 : memref<!tpu.dma_semaphore, #tpu.memory_space<semaphore_mem>>)
    tpu.wait_dma2 semaphore(%arg2 : memref<!tpu.dma_semaphore, #tpu.memory_space<semaphore_mem>>) src(%arg0 : memref<16x128xf32, #tpu.memory_space<any>>) dst(%arg1 : memref<16x128xf32, #tpu.memory_space<any>>)
    return
  }
}

</mosaic_0001>

<bundles_post_ra>
// kernel: tpu_custom_call.1
= control target key start
LH: loop header
LB: loop body
LE: loop exit
PB: predicated region body
PF: predicated region fallthrough
CT: control target
= control target key end

     0   :  { %s34_s6 = smov [#allocation2]   ;;  %s35_s7 = smov [#allocation3]   ;;  %s53_s0 = inlined_call_operand.hbm [shape: f32[16,128], index: 0, kind: input, shape index: {}]   ;;  %s54_s1 = inlined_call_operand.hbm [shape: f32[16,128], index: 1, kind: output, shape index: {}]  }
   0x1   :  { %s36_s8 = smov 0  }
   0x2   :  { %18 = dma.general %s53_s0, 256, %s54_s1, %s34_s6, %s35_s7, [#allocation4], %s36_s8, 0  }
   0x3   :  { %32 = dma.done.wait [#allocation2], 256 }
   0x4   :  { %33 = vsyncadd [#allocation2], 4294967040 }
   0x5   :  { %22 = vsyncmov [#allocation2] }
   0x8   :  { %s23_s13 = vpop.sfrf %22 }
   0x9   :  { %p28_p0 = scmp.ne.s32.totalorder %s23_s13, 0 }
   0xb   :  { %27 = shalt.err (%p28_p0)  }

</bundles_post_ra>
